<compile_context>
chip_gen: v7x
topology: tpu7x:2x2x1
jax: 0.10.0
libtpu: 0.0.40
codegen_flags: <defaults>
</compile_context>

<pallas_src>
import functools

import jax
import jax.numpy as jnp
from jax.experimental import pallas as pl
from jax.experimental.pallas import tpu as pltpu


def _round_up(v, m):
    return ((v + m - 1) // m) * m


def _fused_head_kernel(x_ref, w_ref, b_ref, out_ref):
    # One wide matmul (cls + bbox heads fused, lane-padded) + bias add.
    acc = jnp.dot(x_ref[...], w_ref[...], preferred_element_type=jnp.float32)
    out_ref[...] = (acc + b_ref[...]).astype(out_ref.dtype)


def fuse_params(w_cls, b_cls, w_bbox, b_bbox, dtype=None):
    """Fuse the two Linear heads into one lane-padded weight/bias.

    Call ONCE per model (not per forward).  The bbox block starts at a
    128-lane-aligned offset so the post-kernel split is a contiguous slice.

    w_cls:  [C, num_classes]        b_cls:  [num_classes]
    w_bbox: [C, num_classes * 4]    b_bbox: [num_classes * 4]
    returns (w_fused [C, out_pad], b_fused [1, out_pad])
    """
    c, nc = w_cls.shape
    nb = w_bbox.shape[1]
    off = _round_up(nc, 128)
    end = off + _round_up(nb, 128)
    w_dtype = dtype if dtype is not None else w_cls.dtype
    w_fused = jnp.concatenate(
        [
            jnp.pad(w_cls.astype(w_dtype), ((0, 0), (0, off - nc))),
            jnp.pad(w_bbox.astype(w_dtype), ((0, 0), (0, end - off - nb))),
        ],
        axis=1,
    )
    # Bias kept in f32 regardless of weight dtype (f32 epilogue in-kernel).
    b_fused = jnp.concatenate(
        [
            jnp.pad(b_cls.astype(jnp.float32), (0, off - nc)),
            jnp.pad(b_bbox.astype(jnp.float32), (0, end - off - nb)),
        ]
    )[None, :]
    return w_fused, b_fused


@functools.partial(jax.jit, static_argnames=("num_classes", "tile_m"))
def fast_rcnn_predictor(x, w_fused, b_fused, *, num_classes, tile_m=512):
    """Forward pass matching FastRCNNPredictor.forward.

    x: [N, C] or [N, C, 1, 1]
    w_fused / b_fused: output of fuse_params (hoisted out of the hot path).
    returns (scores [N, num_classes] f32, bbox_deltas [N, num_classes*4] f32)
    """
    if x.ndim == 4:
        assert list(x.shape[2:]) == [1, 1]
    x2d = x.reshape(x.shape[0], -1)  # flatten(start_dim=1)

    n, c = x2d.shape
    nc = num_classes
    nb = 4 * num_classes
    off = _round_up(nc, 128)
    out_pad = w_fused.shape[1]
    assert w_fused.shape[0] == c
    assert out_pad == off + _round_up(nb, 128)

    # Optional bf16 weights -> bf16 activations (f32 accumulation in-kernel).
    if w_fused.dtype == jnp.bfloat16 and x2d.dtype != jnp.bfloat16:
        x2d = x2d.astype(jnp.bfloat16)

    # ---- ROI tile size ----------------------------------------------------
    # Small N: single block (no pipeline prologue / per-step overhead).
    # Large N: cap at tile_m (v5e/v6e per-step amortization) but keep >= 2
    # grid steps so the "parallel" axis can shard across both v7x TCs.
    n8 = _round_up(max(n, 1), 8)
    if n8 <= tile_m:
        tm = n8
    else:
        tm = min(tile_m, _round_up(pl.cdiv(n8, 2), 8))
    grid_m = pl.cdiv(n, tm)  # ragged edge block handled by Pallas masking

    x_bytes = jnp.dtype(x2d.dtype).itemsize
    w_bytes = jnp.dtype(w_fused.dtype).itemsize
    cost = pl.CostEstimate(
        flops=2 * n * c * out_pad,
        transcendentals=0,
        bytes_accessed=(n * c * x_bytes + c * out_pad * w_bytes
                        + out_pad * 4 + n * out_pad * 4),
    )

    out = pl.pallas_call(
        _fused_head_kernel,
        out_shape=jax.ShapeDtypeStruct((n, out_pad), jnp.float32),
        grid=(grid_m,),
        in_specs=[
            pl.BlockSpec((tm, c), lambda i: (i, 0)),       # x tile streams
            pl.BlockSpec((c, out_pad), lambda i: (0, 0)),  # weights resident
            pl.BlockSpec((1, out_pad), lambda i: (0, 0)),  # bias resident
        ],
        out_specs=pl.BlockSpec((tm, out_pad), lambda i: (i, 0)),
        compiler_params=pltpu.CompilerParams(
            dimension_semantics=("parallel",)),
        cost_estimate=cost,
    )(x2d, w_fused, b_fused)

    # Both slices start at lane-aligned offsets (0 and off), so they are
    # cheap contiguous slices, not cross-lane relayouts.
    scores = out[:, :nc]
    bbox_deltas = out[:, off:off + nb]
    return scores, bbox_deltas


def init_params(key, in_channels, num_classes):
    """Deterministic parameter init mimicking nn.Linear's uniform init."""
    k1, k2, k3, k4 = jax.random.split(key, 4)
    bound = 1.0 / jnp.sqrt(in_channels)
    w_cls = jax.random.uniform(k1, (in_channels, num_classes),
                               jnp.float32, -bound, bound)
    b_cls = jax.random.uniform(k2, (num_classes,), jnp.float32, -bound, bound)
    w_bbox = jax.random.uniform(k3, (in_channels, num_classes * 4),
                                jnp.float32, -bound, bound)
    b_bbox = jax.random.uniform(k4, (num_classes * 4,),
                                jnp.float32, -bound, bound)
    return w_cls, b_cls, w_bbox, b_bbox


if __name__ == "__main__":
    key = jax.random.PRNGKey(0)
    kx, kp = jax.random.split(key)

    batch = 8
    in_channels = 32
    num_classes = 4

    # Same shape convention as the PyTorch head input after ROI pooling:
    # NCHW with 1x1 spatial.
    x = jax.random.normal(kx, (batch, in_channels, 1, 1), jnp.float32)
    w_cls, b_cls, w_bbox, b_bbox = init_params(kp, in_channels, num_classes)

    # Fuse the two heads ONCE (model-construction time, not per forward).
    w_fused, b_fused = fuse_params(w_cls, b_cls, w_bbox, b_bbox)

    scores, bbox_deltas = fast_rcnn_predictor(
        x, w_fused, b_fused, num_classes=num_classes)
    jax.block_until_ready((scores, bbox_deltas))

    # Reference check in plain JAX.
    x2d = x.reshape(batch, -1)
    scores_ref = x2d @ w_cls + b_cls
    bbox_ref = x2d @ w_bbox + b_bbox
    assert scores.shape == (batch, num_classes)
    assert bbox_deltas.shape == (batch, num_classes * 4)
    assert jnp.allclose(scores, scores_ref, atol=1e-5)
    assert jnp.allclose(bbox_deltas, bbox_ref, atol=1e-5)

    print("KERNEL_OK")
</pallas_src>

<mosaic_0001>
module attributes {stable_mosaic.version = 11 : i64} {
  func.func @_fused_head_kernel(%arg0: i32, %arg1: memref<8x32xf32, #tpu.memory_space<vmem>>, %arg2: memref<32x256xf32, #tpu.memory_space<vmem>>, %arg3: memref<1x256xf32, #tpu.memory_space<vmem>>, %arg4: memref<8x256xf32, #tpu.memory_space<vmem>>) attributes {dimension_semantics = [#tpu.dimension_semantics<parallel>], iteration_bounds = array<i64: 1>, scalar_prefetch = 0 : i64, scratch_operands = 0 : i64, tpu.core_type = #tpu.core_type<tc>, window_params = [{transform_indices = @transform_0, window_bounds = array<i64: 8, 32>}, {pipeline_mode = #tpu.pipeline_mode<synchronous>, transform_indices = @transform_1, window_bounds = array<i64: 32, 256>}, {pipeline_mode = #tpu.pipeline_mode<synchronous>, transform_indices = @transform_2, window_bounds = array<i64: 1, 256>}, {transform_indices = @transform_3, window_bounds = array<i64: 8, 256>}]} {
    %c0 = arith.constant 0 : index
    %c0_0 = arith.constant 0 : index
    %0 = vector.load %arg1[%c0, %c0_0] : memref<8x32xf32, #tpu.memory_space<vmem>>, vector<8x32xf32>
    %c0_1 = arith.constant 0 : index
    %c0_2 = arith.constant 0 : index
    %1 = vector.load %arg2[%c0_1, %c0_2] : memref<32x256xf32, #tpu.memory_space<vmem>>, vector<32x256xf32>
    %cst = arith.constant dense<0.000000e+00> : vector<8x256xf32>
    %2 = tpu.matmul %0, %1, %cst {dimension_numbers = #tpu.dot_dimension_numbers<[1], [0], [0], [1], [0, 0, 1, 1], [], []>} : vector<8x32xf32>, vector<32x256xf32>, vector<8x256xf32> -> vector<8x256xf32>
    %c0_3 = arith.constant 0 : index
    %c0_4 = arith.constant 0 : index
    %3 = vector.load %arg3[%c0_3, %c0_4] : memref<1x256xf32, #tpu.memory_space<vmem>>, vector<1x256xf32>
    %4 = vector.broadcast %3 : vector<1x256xf32> to vector<8x256xf32>
    %5 = arith.addf %2, %4 : vector<8x256xf32>
    %c0_5 = arith.constant 0 : index
    %c0_6 = arith.constant 0 : index
    %6 = vector.load %arg4[%c0_5, %c0_6] : memref<8x256xf32, #tpu.memory_space<vmem>>, vector<8x256xf32>
    tpu.vector_store %arg4[%c0_5, %c0_6], %5 {strides = array<i32>} : memref<8x256xf32, #tpu.memory_space<vmem>>, vector<8x256xf32>,
    return
  }
  func.func @transform_0(%arg0: i32) -> (i32, i32) {
    %c0_i32 = arith.constant 0 : i32
    %c0_i32_0 = arith.constant 0 : i32
    return %arg0, %c0_i32 : i32, i32
  }
  func.func @transform_1(%arg0: i32) -> (i32, i32) {
    %c0_i32 = arith.constant 0 : i32
    %c0_i32_0 = arith.constant 0 : i32
    %c0_i32_1 = arith.constant 0 : i32
    return %c0_i32, %c0_i32_0 : i32, i32
  }
  func.func @transform_2(%arg0: i32) -> (i32, i32) {
    %c0_i32 = arith.constant 0 : i32
    %c0_i32_0 = arith.constant 0 : i32
    %c0_i32_1 = arith.constant 0 : i32
    return %c0_i32, %c0_i32_0 : i32, i32
  }
  func.func @transform_3(%arg0: i32) -> (i32, i32) {
    %c0_i32 = arith.constant 0 : i32
    %c0_i32_0 = arith.constant 0 : i32
    return %arg0, %c0_i32 : i32, i32
  }
}

</mosaic_0001>

<bundles_post_ra>
// kernel: fast_rcnn_predictor.1
= control target key start
LH: loop header
LB: loop body
LE: loop exit
PB: predicated region body
PF: predicated region fallthrough
CT: control target
= control target key end

     0   :  { %8 = vsyncpa [#allocation3], 0  ;;  %s271_s0 = inlined_call_operand.hbm [shape: f32[8,32], index: 0, kind: input, shape index: {}]   ;;  %s272_s1 = inlined_call_operand.hbm [shape: f32[32,256], index: 1, kind: input, shape index: {}]   ;;  %s273_s2 = inlined_call_operand.vmem [shape: f32[1,256], index: 2, kind: input, shape index: {}]   ;;  %s274_s3 = inlined_call_operand.vmem [shape: f32[8,256], index: 3, kind: output, shape index: {}]  }
   0x1   :  { %9 = vsyncpa [#allocation5], 0  ;;  %s206_s12 = smov [#allocation2]   ;;  %s207_s14 = smov [#allocation4]  }
   0x2   :  { %s16_s13 = sshll.u32 %s206_s12, 4  ;;  %s25_s15 = sshll.u32 %s207_s14, 4  ;;  %s17_s13 = int_to_ptr.vmem [resolvable:$true] %s16_s13  ;;  %s231_s15 = int_to_ptr.vmem [resolvable:$true] %s25_s15 }
   0x3   :  { %s158_s18 = scalar_lea.hbm %s271_s0, 128 }
   0x4   :  { %p159_p0 = scmp.ne.s32.totalorder %s271_s0, %s158_s18  ;;  %p162_p1 = scmp.lt.u32.totalorder %s158_s18, %s271_s0 }
   0x6   :  { %p164_p2 = pnand %p162_p1, %p159_p0 }
   0x8   :  { %167 = shalt.err (!%p164_p2)
}
   0x9   :  { %s168_s23 = scalar_lea.vmem %s17_s13, 128  ;;  %p173_p4 = scmp.lt.s32.totalorder %s17_s13, %s17_s13 }
   0xa   :  { %p169_p3 = scmp.ne.s32.totalorder %s17_s13, %s168_s23  ;;  %p174_p5 = scmp.lt.s32.totalorder %s168_s23, %s168_s23 }
   0xc   :  { %p175_p6 = por %p174_p5, %p173_p4 }
   0xe   :  { %p176_p7 = pnand %p175_p6, %p169_p3 }
  0x10   :  { %179 = shalt.err (!%p176_p7)
}
  0x11   :  { %19 = dma.hbm_to_vmem [thread:$0]  %s271_s0, 128, %s17_s13, [#allocation3]  }
  0x12   :  { %s180_s28 = scalar_lea.hbm %s272_s1, 1024 }
  0x13   :  { %p181_p8 = scmp.ne.s32.totalorder %s272_s1, %s180_s28  ;;  %p184_p9 = scmp.lt.u32.totalorder %s180_s28, %s272_s1 }
  0x15   :  { %p186_p10 = pnand %p184_p9, %p181_p8 }
  0x17   :  { %189 = shalt.err (!%p186_p10)
}
  0x18   :  { %s190_s6 = scalar_lea.vmem %s231_s15, 1024  ;;  %p195_p12 = scmp.lt.s32.totalorder %s231_s15, %s231_s15 }
  0x19   :  { %p191_p11 = scmp.ne.s32.totalorder %s231_s15, %s190_s6  ;;  %p196_p13 = scmp.lt.s32.totalorder %s190_s6, %s190_s6 }
  0x1b   :  { %p197_p0 = por %p196_p13, %p195_p12 }
  0x1d   :  { %p198_p1 = pnand %p197_p0, %p191_p11 }
  0x1f   :  { %201 = shalt.err (!%p198_p1)
}
  0x20   :  { %s208_s0 = smov 256   ;;  %s209_s7 = smov 16  }
  0x21   :  { %31 = dma.hbm_to_vmem [thread:$0]  %s272_s1, 1024, %s231_s15, [#allocation5], %s208_s0, %s208_s0, %s209_s7  }
  0x22   :  { %202 = dma.done.wait [#allocation3], 128  }
  0x23   :  { %203 = vsyncadd [#allocation3], 4294967168 }
  0x24   :  { %204 = dma.done.wait [#allocation5], 1024  }
  0x25   :  { %205 = vsyncadd [#allocation5], 4294966272  ;;  %v210_v0 = vmov 0.0   ;;  %v42_v1 = vld [vmem:[#allocation4 + $0x8] sm:$0xff]  ;;  %v44_v2 = vld [vmem:[#allocation4 + $0x18] sm:$0xff]  ;;  %vm61_vm0 = vcmask 261120   ;;  %v51_v14 = vlaneseq }
  0x26   :  { %129 = vmatprep.mubr.f32.mxu0 %v210_v0  ;;  %v41_v3 = vld [vmem:[#allocation4] sm:$0xff]  ;;  %v145_v4 = vpack.c.bf16 %v44_v2, %v42_v1  ;;  %v43_v5 = vld [vmem:[#allocation4 + $0x10] sm:$0xff]  ;;  %v46_v6 = vld [vmem:[#allocation4 + $0x28] sm:$0xff] }
  0x27   :  { %v48_v7 = vld [vmem:[#allocation4 + $0x38] sm:$0xff]  ;;  %v147_v8 = vpack.c.bf16 %v43_v5, %v41_v3  ;;  %v45_v10 = vld [vmem:[#allocation4 + $0x20] sm:$0xff]  ;;  %v47_v11 = vld [vmem:[#allocation4 + $0x30] sm:$0xff]  ;;  %v52_v15 = vshrl.u32 %v51_v14, 7 }
  0x28   :  { %v149_v9 = vpack.c.bf16 %v48_v7, %v46_v6  ;;  %146 = vmatprep.subr.bf16.mxu0 %v145_v4  ;;  %v151_v12 = vpack.c.bf16 %v47_v11, %v45_v10  ;;  %v40_v13 = vld [vmem:[#allocation2] sm:$0xff] }
  0x29   :  { %148 = vmatpush1.bf16.msra.mxu0 %v147_v8  ;;  %v53_v16 = vsub.s32 0, %v52_v15  ;;  %v49_v17 = vld [vmem:[%s273_s2] sm:$0x3]  ;;  %v57_v18 = vsub.s32 1, %v52_v15 }
  0x2a   :  { %150 = vmatprep.subr.bf16.mxu0 %v149_v9 }
  0x2b   :  { %v54_v19 = vrot.slane %v49_v17, %v53_v16  ;;  %v58_v20 = vrot.slane %v49_v17, %v57_v18 }
  0x2d   :  { %152 = vmatpush1.bf16.msra.mxu0 %v151_v12 }
  0x30   :  { %144 = vmatmul.mubr.msk.f32.vlgmr.msra.gmra.mrb[0].mxu0 %vm61_vm0, %v40_v13 }
 0x103   :  { %v131_v21 = vpop.f32.mrb[0].mxu0 }
 0x104   :  { %v132_v22 = vadd.f32 %v131_v21, %v54_v19  ;;  %v133_v23 = vpop.f32.mrb[1].mxu0 }
 0x105   :  { %v134_v24 = vadd.f32 %v133_v23, %v58_v20 }
 0x106   :  { %136 = vst [vmem:[%s274_s3] sm:$0xff] %v132_v22 }
 0x107   :  { %137 = vst [vmem:[%s274_s3 + $0x8] sm:$0xff] %v134_v24 }
 0x108   :  { %142 = vsyncpa [#allocation3], 1 }
 0x109   :  { %143 = vsyncpa [#allocation5], 1 }

</bundles_post_ra>
